<compile_context>
chip_gen: v6e
topology: v6e:2x2x1
jax: 0.10.0
libtpu: 0.0.40
codegen_flags: <defaults>
</compile_context>

<pallas_src>
import functools

import jax
import jax.numpy as jnp
from jax.experimental import pallas as pl
from jax.experimental.pallas import tpu as pltpu

LN_EPS = 1e-5  # torch.nn.LayerNorm default


def _round_up(n, m):
    return ((n + m - 1) // m) * m


def _layernorm(x, gamma, beta):
    # Two-moment form: both reductions are independent -> they overlap on the
    # XLUs instead of serializing (reduce -> sub -> reduce).
    mean = jnp.mean(x, axis=-1, keepdims=True)
    m2 = jnp.mean(x * x, axis=-1, keepdims=True)
    var = jnp.maximum(m2 - mean * mean, 0.0)  # guard tiny negative from cancellation
    inv = jax.lax.rsqrt(var + LN_EPS)
    return (x - mean) * inv * gamma + beta


def mlp_kernel(x_ref,
               w1_ref, b1_ref, g1_ref, be1_ref,
               w2_ref, b2_ref, g2_ref, be2_ref,
               w3_ref, b3_ref,
               o_ref, *, approx_sigmoid):
    # Matmuls run in the weights' dtype (f32 or bf16) with f32 accumulation.
    x = x_ref[...]

    # Layer 1: Linear -> LayerNorm -> ReLU  (epilogue in f32)
    h = jnp.dot(x, w1_ref[...], preferred_element_type=jnp.float32) + b1_ref[...]
    h = _layernorm(h, g1_ref[...], be1_ref[...])
    h = jnp.maximum(h, 0.0)

    # Layer 2: Linear -> LayerNorm -> ReLU
    h = jnp.dot(h.astype(w2_ref.dtype), w2_ref[...],
                preferred_element_type=jnp.float32) + b2_ref[...]
    h = _layernorm(h, g2_ref[...], be2_ref[...])
    h = jnp.maximum(h, 0.0)

    # Output layer: Linear -> Sigmoid
    o = jnp.dot(h.astype(w3_ref.dtype), w3_ref[...],
                preferred_element_type=jnp.float32) + b3_ref[...]
    denom = 1.0 + jnp.exp(-o)          # exp -> EUP
    if approx_sigmoid:
        sig = pl.reciprocal(denom, approx=True)   # reciprocal -> EUP (free slot)
    else:
        sig = 1.0 / denom
    o_ref[...] = sig.astype(o_ref.dtype)


@functools.partial(jax.jit,
                   static_argnames=("tile_b", "compute_dtype", "approx_sigmoid"))
def mlp_forward(x, params, *, tile_b=512, compute_dtype=jnp.float32,
                approx_sigmoid=True):
    (w1, b1, g1, be1, w2, b2, g2, be2, w3, b3) = params
    B, i_size = x.shape
    h_size = w1.shape[1]
    o_size = w3.shape[1]

    # Tile size: multiple of 8 (sublane), capped by the (padded) batch.
    tile_b = max(8, min(tile_b, _round_up(B, 8)))
    B_pad = _round_up(B, tile_b)
    if B_pad != B:
        x = jnp.pad(x, ((0, B_pad - B), (0, 0)))

    # Matmul operands in compute_dtype (bf16 on v6e/v7x for MXU peak);
    # bias / LayerNorm params and all accumulation stay f32.
    x = x.astype(compute_dtype)
    w1c = w1.astype(compute_dtype)
    w2c = w2.astype(compute_dtype)
    w3c = w3.astype(compute_dtype)

    grid = (B_pad // tile_b,)

    def resident(shape):
        # Same block index at every grid step -> stays in VMEM, fetched once.
        return pl.BlockSpec(shape, lambda i: (0, 0))

    operands = (x, w1c, b1, g1, be1, w2c, b2, g2, be2, w3c, b3)
    flops = 2 * B_pad * (i_size * h_size + h_size * h_size + h_size * o_size)
    transcendentals = B_pad * (o_size + 2)  # sigmoid exp + 2 LayerNorm rsqrt / row
    bytes_accessed = (sum(int(a.size) * a.dtype.itemsize for a in operands)
                      + B_pad * o_size * 4)

    kernel = functools.partial(mlp_kernel, approx_sigmoid=approx_sigmoid)

    out = pl.pallas_call(
        kernel,
        out_shape=jax.ShapeDtypeStruct((B_pad, o_size), jnp.float32),
        grid=grid,
        in_specs=[
            pl.BlockSpec((tile_b, i_size), lambda i: (i, 0)),   # x: tiled over batch
            resident((i_size, h_size)),                         # w1
            resident((1, h_size)),                              # b1
            resident((1, h_size)),                              # gamma1
            resident((1, h_size)),                              # beta1
            resident((h_size, h_size)),                         # w2
            resident((1, h_size)),                              # b2
            resident((1, h_size)),                              # gamma2
            resident((1, h_size)),                              # beta2
            resident((h_size, o_size)),                         # w3
            resident((1, o_size)),                              # b3
        ],
        out_specs=pl.BlockSpec((tile_b, o_size), lambda i: (i, 0)),
        compiler_params=pltpu.CompilerParams(
            dimension_semantics=("parallel",)),
        cost_estimate=pl.CostEstimate(flops=flops,
                                      transcendentals=transcendentals,
                                      bytes_accessed=bytes_accessed),
    )(*operands)
    return out[:B]


def init_params(key, i_size, h_size, o_size):
    """Deterministic init mimicking the module: xavier_normal_(gain=sqrt(2)) on
    Linear weights, zeros for biases, (ones, zeros) for LayerNorm affine."""
    def xavier_normal(k, fan_in, fan_out):
        gain = jnp.sqrt(2.0)  # calculate_gain('relu')
        std = gain * jnp.sqrt(2.0 / (fan_in + fan_out))
        # Stored as [in, out] so the kernel does x @ W.
        return (std * jax.random.normal(k, (fan_in, fan_out))).astype(jnp.float32)

    k1, k2, k3 = jax.random.split(key, 3)
    w1 = xavier_normal(k1, i_size, h_size)
    b1 = jnp.zeros((1, h_size), jnp.float32)
    g1 = jnp.ones((1, h_size), jnp.float32)
    be1 = jnp.zeros((1, h_size), jnp.float32)
    w2 = xavier_normal(k2, h_size, h_size)
    b2 = jnp.zeros((1, h_size), jnp.float32)
    g2 = jnp.ones((1, h_size), jnp.float32)
    be2 = jnp.zeros((1, h_size), jnp.float32)
    w3 = xavier_normal(k3, h_size, o_size)
    b3 = jnp.zeros((1, o_size), jnp.float32)
    return (w1, b1, g1, be1, w2, b2, g2, be2, w3, b3)


def reference_forward(x, params):
    (w1, b1, g1, be1, w2, b2, g2, be2, w3, b3) = params

    def ln(h, g, be):
        mean = jnp.mean(h, axis=-1, keepdims=True)
        var = jnp.mean(jnp.square(h - mean), axis=-1, keepdims=True)
        return (h - mean) * jax.lax.rsqrt(var + LN_EPS) * g + be

    h = x @ w1 + b1
    h = jnp.maximum(ln(h, g1, be1), 0.0)
    h = h @ w2 + b2
    h = jnp.maximum(ln(h, g2, be2), 0.0)
    return jax.nn.sigmoid(h @ w3 + b3)


if __name__ == "__main__":
    # Small shapes consistent with the module: 4 fn nodes + 4 u nodes (size-1
    # features each) -> i_size = 8; h_size = 128; o_size = 4; batch = 8.
    B = 8
    n_fn, n_u = 4, 4
    i_size = n_fn + n_u
    h_size = 128
    o_size = 4

    key = jax.random.PRNGKey(0)
    k_fn, k_u, k_param, k_big = jax.random.split(key, 4)

    # Per-node size-1 feature columns (the dict values the PyTorch forward concatenates).
    fn_vals = [jax.random.normal(jax.random.fold_in(k_fn, i), (B, 1), jnp.float32)
               for i in range(n_fn)]
    u_vals = [jax.random.normal(jax.random.fold_in(k_u, i), (B, 1), jnp.float32)
              for i in range(n_u)]
    # Glue: concatenation along dim=1 (same as T.cat((inp_fn, inp_u), dim=1)).
    x = jnp.concatenate(fn_vals + u_vals, axis=1)  # [B, i_size]

    params = init_params(k_param, i_size, h_size, o_size)
    ref = reference_forward(x, params)

    # 1) Exact path: f32 matmuls, exact reciprocal — tight tolerance.
    out = jax.block_until_ready(
        mlp_forward(x, params, compute_dtype=jnp.float32, approx_sigmoid=False))
    assert out.shape == (B, o_size)
    assert jnp.allclose(out, ref, atol=1e-5, rtol=1e-5)

    # 2) Fast path: bf16 matmul inputs (f32 accumulation) + EUP approx-reciprocal sigmoid.
    out_fast = jax.block_until_ready(
        mlp_forward(x, params, compute_dtype=jnp.bfloat16, approx_sigmoid=True))
    assert jnp.allclose(out_fast, ref, atol=2e-2, rtol=2e-2)

    # 3) Multi-tile grid path: exercises batch tiling, padding and the parallel axis.
    B2 = 200
    x2 = jax.random.normal(k_big, (B2, i_size), jnp.float32)
    out2 = jax.block_until_ready(
        mlp_forward(x2, params, tile_b=64, compute_dtype=jnp.float32,
                    approx_sigmoid=True))
    ref2 = reference_forward(x2, params)
    assert out2.shape == (B2, o_size)
    assert jnp.allclose(out2, ref2, atol=2e-3, rtol=2e-3)

    print("KERNEL_OK")
</pallas_src>

<mosaic_0001>
module attributes {stable_mosaic.version = 11 : i64} {
  func.func @mlp_kernel(%arg0: i32, %arg1: memref<8x8xf32, #tpu.memory_space<vmem>>, %arg2: memref<8x128xf32, #tpu.memory_space<vmem>>, %arg3: memref<1x128xf32, #tpu.memory_space<vmem>>, %arg4: memref<1x128xf32, #tpu.memory_space<vmem>>, %arg5: memref<1x128xf32, #tpu.memory_space<vmem>>, %arg6: memref<128x128xf32, #tpu.memory_space<vmem>>, %arg7: memref<1x128xf32, #tpu.memory_space<vmem>>, %arg8: memref<1x128xf32, #tpu.memory_space<vmem>>, %arg9: memref<1x128xf32, #tpu.memory_space<vmem>>, %arg10: memref<128x4xf32, #tpu.memory_space<vmem>>, %arg11: memref<1x4xf32, #tpu.memory_space<vmem>>, %arg12: memref<8x4xf32, #tpu.memory_space<vmem>>) attributes {dimension_semantics = [#tpu.dimension_semantics<parallel>], iteration_bounds = array<i64: 1>, scalar_prefetch = 0 : i64, scratch_operands = 0 : i64, tpu.core_type = #tpu.core_type<tc>, window_params = [{transform_indices = @transform_0, window_bounds = array<i64: 8, 8>}, {pipeline_mode = #tpu.pipeline_mode<synchronous>, transform_indices = @transform_1, window_bounds = array<i64: 8, 128>}, {pipeline_mode = #tpu.pipeline_mode<synchronous>, transform_indices = @transform_2, window_bounds = array<i64: 1, 128>}, {pipeline_mode = #tpu.pipeline_mode<synchronous>, transform_indices = @transform_3, window_bounds = array<i64: 1, 128>}, {pipeline_mode = #tpu.pipeline_mode<synchronous>, transform_indices = @transform_4, window_bounds = array<i64: 1, 128>}, {pipeline_mode = #tpu.pipeline_mode<synchronous>, transform_indices = @transform_5, window_bounds = array<i64: 128, 128>}, {pipeline_mode = #tpu.pipeline_mode<synchronous>, transform_indices = @transform_6, window_bounds = array<i64: 1, 128>}, {pipeline_mode = #tpu.pipeline_mode<synchronous>, transform_indices = @transform_7, window_bounds = array<i64: 1, 128>}, {pipeline_mode = #tpu.pipeline_mode<synchronous>, transform_indices = @transform_8, window_bounds = array<i64: 1, 128>}, {pipeline_mode = #tpu.pipeline_mode<synchronous>, transform_indices = @transform_9, window_bounds = array<i64: 128, 4>}, {pipeline_mode = #tpu.pipeline_mode<synchronous>, transform_indices = @transform_10, window_bounds = array<i64: 1, 4>}, {transform_indices = @transform_11, window_bounds = array<i64: 8, 4>}]} {
    %c0 = arith.constant 0 : index
    %c0_0 = arith.constant 0 : index
    %0 = vector.load %arg1[%c0, %c0_0] : memref<8x8xf32, #tpu.memory_space<vmem>>, vector<8x8xf32>
    %c0_1 = arith.constant 0 : index
    %c0_2 = arith.constant 0 : index
    %1 = vector.load %arg2[%c0_1, %c0_2] : memref<8x128xf32, #tpu.memory_space<vmem>>, vector<8x128xf32>
    %cst = arith.constant dense<0.000000e+00> : vector<8x128xf32>
    %2 = tpu.matmul %0, %1, %cst {dimension_numbers = #tpu.dot_dimension_numbers<[1], [0], [0], [1], [0, 0, 1, 1], [], []>} : vector<8x8xf32>, vector<8x128xf32>, vector<8x128xf32> -> vector<8x128xf32>
    %c0_3 = arith.constant 0 : index
    %c0_4 = arith.constant 0 : index
    %3 = vector.load %arg3[%c0_3, %c0_4] : memref<1x128xf32, #tpu.memory_space<vmem>>, vector<1x128xf32>
    %4 = vector.broadcast %3 : vector<1x128xf32> to vector<8x128xf32>
    %5 = arith.addf %2, %4 : vector<8x128xf32>
    %c0_5 = arith.constant 0 : index
    %c0_6 = arith.constant 0 : index
    %6 = vector.load %arg4[%c0_5, %c0_6] : memref<1x128xf32, #tpu.memory_space<vmem>>, vector<1x128xf32>
    %c0_7 = arith.constant 0 : index
    %c0_8 = arith.constant 0 : index
    %7 = vector.load %arg5[%c0_7, %c0_8] : memref<1x128xf32, #tpu.memory_space<vmem>>, vector<1x128xf32>
    %cst_9 = arith.constant dense<0.000000e+00> : vector<8xf32>
    %8 = vector.multi_reduction <add>, %5, %cst_9 [1] : vector<8x128xf32> to vector<8xf32>
    %9 = vector.shape_cast %8 : vector<8xf32> to vector<8x1xf32>
    %cst_10 = arith.constant 1.280000e+02 : f32
    %10 = vector.broadcast %cst_10 : f32 to vector<8x1xf32>
    %11 = arith.divf %9, %10 : vector<8x1xf32>
    %12 = arith.mulf %5, %5 : vector<8x128xf32>
    %cst_11 = arith.constant dense<0.000000e+00> : vector<8xf32>
    %13 = vector.multi_reduction <add>, %12, %cst_11 [1] : vector<8x128xf32> to vector<8xf32>
    %14 = vector.shape_cast %13 : vector<8xf32> to vector<8x1xf32>
    %cst_12 = arith.constant 1.280000e+02 : f32
    %15 = vector.broadcast %cst_12 : f32 to vector<8x1xf32>
    %16 = arith.divf %14, %15 : vector<8x1xf32>
    %17 = arith.mulf %11, %11 : vector<8x1xf32>
    %18 = arith.subf %16, %17 : vector<8x1xf32>
    %cst_13 = arith.constant 0.000000e+00 : f32
    %19 = vector.broadcast %cst_13 : f32 to vector<8x1xf32>
    %20 = arith.maximumf %18, %19 : vector<8x1xf32>
    %cst_14 = arith.constant 9.99999974E-6 : f32
    %21 = vector.broadcast %cst_14 : f32 to vector<8x1xf32>
    %22 = arith.addf %20, %21 : vector<8x1xf32>
    %23 = math.rsqrt %22 : vector<8x1xf32>
    %24 = vector.broadcast %11 : vector<8x1xf32> to vector<8x128xf32>
    %25 = arith.subf %5, %24 : vector<8x128xf32>
    %26 = vector.broadcast %23 : vector<8x1xf32> to vector<8x128xf32>
    %27 = arith.mulf %25, %26 : vector<8x128xf32>
    %28 = vector.broadcast %6 : vector<1x128xf32> to vector<8x128xf32>
    %29 = arith.mulf %27, %28 : vector<8x128xf32>
    %30 = vector.broadcast %7 : vector<1x128xf32> to vector<8x128xf32>
    %31 = arith.addf %29, %30 : vector<8x128xf32>
    %cst_15 = arith.constant 0.000000e+00 : f32
    %32 = vector.broadcast %cst_15 : f32 to vector<8x128xf32>
    %33 = arith.maximumf %31, %32 : vector<8x128xf32>
    %c0_16 = arith.constant 0 : index
    %c0_17 = arith.constant 0 : index
    %34 = vector.load %arg6[%c0_16, %c0_17] : memref<128x128xf32, #tpu.memory_space<vmem>>, vector<128x128xf32>
    %cst_18 = arith.constant dense<0.000000e+00> : vector<8x128xf32>
    %35 = tpu.matmul %33, %34, %cst_18 {dimension_numbers = #tpu.dot_dimension_numbers<[1], [0], [0], [1], [0, 0, 1, 1], [], []>} : vector<8x128xf32>, vector<128x128xf32>, vector<8x128xf32> -> vector<8x128xf32>
    %c0_19 = arith.constant 0 : index
    %c0_20 = arith.constant 0 : index
    %36 = vector.load %arg7[%c0_19, %c0_20] : memref<1x128xf32, #tpu.memory_space<vmem>>, vector<1x128xf32>
    %37 = vector.broadcast %36 : vector<1x128xf32> to vector<8x128xf32>
    %38 = arith.addf %35, %37 : vector<8x128xf32>
    %c0_21 = arith.constant 0 : index
    %c0_22 = arith.constant 0 : index
    %39 = vector.load %arg8[%c0_21, %c0_22] : memref<1x128xf32, #tpu.memory_space<vmem>>, vector<1x128xf32>
    %c0_23 = arith.constant 0 : index
    %c0_24 = arith.constant 0 : index
    %40 = vector.load %arg9[%c0_23, %c0_24] : memref<1x128xf32, #tpu.memory_space<vmem>>, vector<1x128xf32>
    %cst_25 = arith.constant dense<0.000000e+00> : vector<8xf32>
    %41 = vector.multi_reduction <add>, %38, %cst_25 [1] : vector<8x128xf32> to vector<8xf32>
    %42 = vector.shape_cast %41 : vector<8xf32> to vector<8x1xf32>
    %cst_26 = arith.constant 1.280000e+02 : f32
    %43 = vector.broadcast %cst_26 : f32 to vector<8x1xf32>
    %44 = arith.divf %42, %43 : vector<8x1xf32>
    %45 = arith.mulf %38, %38 : vector<8x128xf32>
    %cst_27 = arith.constant dense<0.000000e+00> : vector<8xf32>
    %46 = vector.multi_reduction <add>, %45, %cst_27 [1] : vector<8x128xf32> to vector<8xf32>
    %47 = vector.shape_cast %46 : vector<8xf32> to vector<8x1xf32>
    %cst_28 = arith.constant 1.280000e+02 : f32
    %48 = vector.broadcast %cst_28 : f32 to vector<8x1xf32>
    %49 = arith.divf %47, %48 : vector<8x1xf32>
    %50 = arith.mulf %44, %44 : vector<8x1xf32>
    %51 = arith.subf %49, %50 : vector<8x1xf32>
    %cst_29 = arith.constant 0.000000e+00 : f32
    %52 = vector.broadcast %cst_29 : f32 to vector<8x1xf32>
    %53 = arith.maximumf %51, %52 : vector<8x1xf32>
    %cst_30 = arith.constant 9.99999974E-6 : f32
    %54 = vector.broadcast %cst_30 : f32 to vector<8x1xf32>
    %55 = arith.addf %53, %54 : vector<8x1xf32>
    %56 = math.rsqrt %55 : vector<8x1xf32>
    %57 = vector.broadcast %44 : vector<8x1xf32> to vector<8x128xf32>
    %58 = arith.subf %38, %57 : vector<8x128xf32>
    %59 = vector.broadcast %56 : vector<8x1xf32> to vector<8x128xf32>
    %60 = arith.mulf %58, %59 : vector<8x128xf32>
    %61 = vector.broadcast %39 : vector<1x128xf32> to vector<8x128xf32>
    %62 = arith.mulf %60, %61 : vector<8x128xf32>
    %63 = vector.broadcast %40 : vector<1x128xf32> to vector<8x128xf32>
    %64 = arith.addf %62, %63 : vector<8x128xf32>
    %cst_31 = arith.constant 0.000000e+00 : f32
    %65 = vector.broadcast %cst_31 : f32 to vector<8x128xf32>
    %66 = arith.maximumf %64, %65 : vector<8x128xf32>
    %c0_32 = arith.constant 0 : index
    %c0_33 = arith.constant 0 : index
    %67 = vector.load %arg10[%c0_32, %c0_33] : memref<128x4xf32, #tpu.memory_space<vmem>>, vector<128x4xf32>
    %cst_34 = arith.constant dense<0.000000e+00> : vector<8x4xf32>
    %68 = tpu.matmul %66, %67, %cst_34 {dimension_numbers = #tpu.dot_dimension_numbers<[1], [0], [0], [1], [0, 0, 1, 1], [], []>} : vector<8x128xf32>, vector<128x4xf32>, vector<8x4xf32> -> vector<8x4xf32>
    %c0_35 = arith.constant 0 : index
    %c0_36 = arith.constant 0 : index
    %69 = vector.load %arg11[%c0_35, %c0_36] : memref<1x4xf32, #tpu.memory_space<vmem>>, vector<1x4xf32>
    %70 = vector.broadcast %69 : vector<1x4xf32> to vector<8x4xf32>
    %71 = arith.addf %68, %70 : vector<8x4xf32>
    %cst_37 = arith.constant 0.000000e+00 : f32
    %72 = vector.broadcast %cst_37 : f32 to vector<8x4xf32>
    %73 = arith.subf %72, %71 : vector<8x4xf32>
    %74 = math.exp %73 : vector<8x4xf32>
    %cst_38 = arith.constant 1.000000e+00 : f32
    %75 = vector.broadcast %cst_38 : f32 to vector<8x4xf32>
    %76 = arith.addf %75, %74 : vector<8x4xf32>
    %cst_39 = arith.constant 1.000000e+00 : f32
    %77 = vector.broadcast %cst_39 : f32 to vector<8x4xf32>
    %78 = arith.divf %77, %76 : vector<8x4xf32>
    %c0_40 = arith.constant 0 : index
    %c0_41 = arith.constant 0 : index
    %79 = vector.load %arg12[%c0_40, %c0_41] : memref<8x4xf32, #tpu.memory_space<vmem>>, vector<8x4xf32>
    tpu.vector_store %arg12[%c0_40, %c0_41], %78 {strides = array<i32>} : memref<8x4xf32, #tpu.memory_space<vmem>>, vector<8x4xf32>,
    return
  }
  func.func @transform_0(%arg0: i32) -> (i32, i32) {
    %c0_i32 = arith.constant 0 : i32
    %c0_i32_0 = arith.constant 0 : i32
    return %arg0, %c0_i32 : i32, i32
  }
  func.func @transform_1(%arg0: i32) -> (i32, i32) {
    %c0_i32 = arith.constant 0 : i32
    %c0_i32_0 = arith.constant 0 : i32
    %c0_i32_1 = arith.constant 0 : i32
    return %c0_i32, %c0_i32_0 : i32, i32
  }
  func.func @transform_2(%arg0: i32) -> (i32, i32) {
    %c0_i32 = arith.constant 0 : i32
    %c0_i32_0 = arith.constant 0 : i32
    %c0_i32_1 = arith.constant 0 : i32
    return %c0_i32, %c0_i32_0 : i32, i32
  }
  func.func @transform_3(%arg0: i32) -> (i32, i32) {
    %c0_i32 = arith.constant 0 : i32
    %c0_i32_0 = arith.constant 0 : i32
    %c0_i32_1 = arith.constant 0 : i32
    return %c0_i32, %c0_i32_0 : i32, i32
  }
  func.func @transform_4(%arg0: i32) -> (i32, i32) {
    %c0_i32 = arith.constant 0 : i32
    %c0_i32_0 = arith.constant 0 : i32
    %c0_i32_1 = arith.constant 0 : i32
    return %c0_i32, %c0_i32_0 : i32, i32
  }
  func.func @transform_5(%arg0: i32) -> (i32, i32) {
    %c0_i32 = arith.constant 0 : i32
    %c0_i32_0 = arith.constant 0 : i32
    %c0_i32_1 = arith.constant 0 : i32
    return %c0_i32, %c0_i32_0 : i32, i32
  }
  func.func @transform_6(%arg0: i32) -> (i32, i32) {
    %c0_i32 = arith.constant 0 : i32
    %c0_i32_0 = arith.constant 0 : i32
    %c0_i32_1 = arith.constant 0 : i32
    return %c0_i32, %c0_i32_0 : i32, i32
  }
  func.func @transform_7(%arg0: i32) -> (i32, i32) {
    %c0_i32 = arith.constant 0 : i32
    %c0_i32_0 = arith.constant 0 : i32
    %c0_i32_1 = arith.constant 0 : i32
    return %c0_i32, %c0_i32_0 : i32, i32
  }
  func.func @transform_8(%arg0: i32) -> (i32, i32) {
    %c0_i32 = arith.constant 0 : i32
    %c0_i32_0 = arith.constant 0 : i32
    %c0_i32_1 = arith.constant 0 : i32
    return %c0_i32, %c0_i32_0 : i32, i32
  }
  func.func @transform_9(%arg0: i32) -> (i32, i32) {
    %c0_i32 = arith.constant 0 : i32
    %c0_i32_0 = arith.constant 0 : i32
    %c0_i32_1 = arith.constant 0 : i32
    return %c0_i32, %c0_i32_0 : i32, i32
  }
  func.func @transform_10(%arg0: i32) -> (i32, i32) {
    %c0_i32 = arith.constant 0 : i32
    %c0_i32_0 = arith.constant 0 : i32
    %c0_i32_1 = arith.constant 0 : i32
    return %c0_i32, %c0_i32_0 : i32, i32
  }
  func.func @transform_11(%arg0: i32) -> (i32, i32) {
    %c0_i32 = arith.constant 0 : i32
    %c0_i32_0 = arith.constant 0 : i32
    return %arg0, %c0_i32 : i32, i32
  }
}

</mosaic_0001>

<bundles_post_ra>
// kernel: mlp_forward.1
= control target key start
LH: loop header
LB: loop body
LE: loop exit
PB: predicated region body
PF: predicated region fallthrough
CT: control target
= control target key end

     0   :  { %16 = vsyncpa [#allocation3], 0  ;;  %s854_s0 = inlined_call_operand.vmem [shape: f32[8,8], index: 0, kind: input, shape index: {}]   ;;  %s855_s1 = inlined_call_operand.hbm [shape: f32[8,128], index: 1, kind: input, shape index: {}]   ;;  %s856_s2 = inlined_call_operand.vmem [shape: f32[1,128], index: 2, kind: input, shape index: {}]   ;;  %s857_s3 = inlined_call_operand.vmem [shape: f32[1,128], index: 3, kind: input, shape index: {}]   ;;  %s858_s4 = inlined_call_operand.hbm [shape: f32[1,128], index: 4, kind: input, shape index: {}]   ;;  %s859_s5 = inlined_call_operand.vmem [shape: f32[128,128], index: 5, kind: input, shape index: {}]   ;;  %s860_s6 = inlined_call_operand.hbm [shape: f32[1,128], index: 6, kind: input, shape index: {}]   ;;  %s861_s7 = inlined_call_operand.vmem [shape: f32[1,128], index: 7, kind: input, shape index: {}]   ;;  %s862_s8 = inlined_call_operand.vmem [shape: f32[1,128], index: 8, kind: input, shape index: {}]   ;;  %s863_s9 = inlined_call_operand.vmem [shape: f32[128,4], index: 9, kind: input, shape index: {}]   ;;  %s864_s10 = inlined_call_operand.vmem [shape: f32[1,4], index: 10, kind: input, shape index: {}]   ;;  %s865_s11 = inlined_call_operand.vmem [shape: f32[8,4], index: 11, kind: output, shape index: {}]  }
   0x1   :  { %17 = vsyncpa [#allocation5], 0  ;;  %s615_s17 = smov [#allocation4]   ;;  %s616_s19 = smov [#allocation2]  }
   0x2   :  { %s40_s18 = sshll.u32 %s615_s17, 4  ;;  %s26_s20 = sshll.u32 %s616_s19, 4  ;;  %s41_s18 = int_to_ptr.vmem [resolvable:$true] %s40_s18  ;;  %s27_s20 = int_to_ptr.vmem [resolvable:$true] %s26_s20 }
   0x3   :  { %s559_s21 = scalar_lea.vmem %s41_s18, 16  ;;  %s563_s22 = scalar_lea.vmem %s41_s18, 32 }
   0x4   :  { %p560_p0 = scmp.ne.s32.totalorder %s41_s18, %s559_s21  ;;  %p564_p1 = scmp.lt.s32.totalorder %s41_s18, %s41_s18 }
   0x5   :  { %p565_p2 = scmp.lt.s32.totalorder %s563_s22, %s559_s21 }
   0x7   :  { %p566_p3 = por %p565_p2, %p564_p1 }
   0x9   :  { %p567_p4 = pnand %p566_p3, %p560_p0 }
   0xb   :  { %570 = shalt.err (!%p567_p4)
}
   0xc   :  { %43 = dma.hbm_to_vmem [thread:$0]  %s858_s4, 16, %s41_s18, [#allocation5]  }
   0xd   :  { %s579_s25 = scalar_lea.vmem %s27_s20, 128  ;;  %p584_p6 = scmp.lt.s32.totalorder %s27_s20, %s27_s20 }
   0xe   :  { %p580_p5 = scmp.ne.s32.totalorder %s27_s20, %s579_s25  ;;  %p585_p7 = scmp.lt.s32.totalorder %s579_s25, %s579_s25 }
  0x10   :  { %p586_p8 = por %p585_p7, %p584_p6 }
  0x12   :  { %p587_p9 = pnand %p586_p8, %p580_p5 }
  0x14   :  { %590 = shalt.err (!%p587_p9)
}
  0x15   :  { %29 = dma.hbm_to_vmem [thread:$0]  %s855_s1, 128, %s27_s20, [#allocation3]  }
  0x16   :  { %s617_s28 = smov [#allocation6]  }
  0x17   :  { %s52_s29 = sshll.u32 %s617_s28, 4  ;;  %s53_s29 = int_to_ptr.vmem [resolvable:$true] %s52_s29 }
  0x18   :  { %s599_s30 = scalar_lea.vmem %s53_s29, 16  ;;  %s603_s12 = scalar_lea.vmem %s53_s29, 32 }
  0x19   :  { %p600_p10 = scmp.ne.s32.totalorder %s53_s29, %s599_s30  ;;  %p604_p11 = scmp.lt.s32.totalorder %s53_s29, %s53_s29 }
  0x1a   :  { %p605_p12 = scmp.lt.s32.totalorder %s603_s12, %s599_s30 }
  0x1c   :  { %p606_p13 = por %p605_p12, %p604_p11 }
  0x1e   :  { %p607_p0 = pnand %p606_p13, %p600_p10 }
  0x20   :  { %610 = shalt.err (!%p607_p0)
}
  0x21   :  { %55 = dma.hbm_to_vmem [thread:$0]  %s860_s6, 16, %s53_s29, [#allocation5]  }
  0x22   :  { %611 = dma.done.wait [#allocation3], 128  }
  0x23   :  { %612 = vsyncadd [#allocation3], 4294967168 }
  0x24   :  { %613 = dma.done.wait [#allocation5], 32  }
  0x25   :  { %614 = vsyncadd [#allocation5], 4294967264  ;;  %v618_v0 = vmov 0.0   ;;  %vm619_vm0 = vmmov 0   ;;  %vm82_vm1 = vcmask 64512   ;;  %v74_v1 = vld [vmem:[#allocation2] sm:$0xff] }
  0x26   :  { %463 = vmatprep.subr.mxu0 %v618_v0  ;;  %465 = vmatprep.mubr.msk.f32.mxu0 %vm619_vm0, %v618_v0  ;;  %v73_v2 = vld [vmem:[%s854_s0] sm:$0xff]  ;;  %v203_v8 = vld [vmem:[%s859_s5 + $0x78] sm:$0xff]  ;;  %v202_v9 = vld [vmem:[%s859_s5 + $0x70] sm:$0xff]  ;;  %vm411_vm2 = vcmask 31744  }
  0x27   :  { %468 = vmatprep.subr.mxu1 %v618_v0  ;;  %500 = vmatprep.mubr.msk.f32.mxu1 %vm619_vm0, %v618_v0  ;;  %v419_v3 = vld [vmem:[%s856_s2] ss:$0 sm:$0xff]  ;;  %v201_v10 = vld [vmem:[%s859_s5 + $0x68] sm:$0xff]  ;;  %v199_v12 = vld [vmem:[%s859_s5 + $0x58] sm:$0xff] }
  0x28   :  { %464 = vmatpush3.msra.mxu0 %v74_v1  ;;  %469 = vmatpush3.msra.mxu1 %v203_v8  ;;  %v200_v11 = vld [vmem:[%s859_s5 + $0x60] sm:$0xff]  ;;  %v198_v13 = vld [vmem:[%s859_s5 + $0x50] sm:$0xff]  ;;  %v197_v14 = vld [vmem:[%s859_s5 + $0x48] sm:$0xff] }
  0x29   :  { %466 = vmatmul.mubr.msk.f32.vlgmr.msra.gmra.mxu0 %vm82_vm1, %v73_v2  ;;  %503 = vmatprep.subr.mxu0 %v618_v0  ;;  %v196_v15 = vld [vmem:[%s859_s5 + $0x40] sm:$0xff]  ;;  %v195_v16 = vld [vmem:[%s859_s5 + $0x38] sm:$0xff]  ;;  %v194_v17 = vld [vmem:[%s859_s5 + $0x30] sm:$0xff] }
  0x2a   :  { %535 = vmatprep.mubr.msk.f32.mxu0 %vm619_vm0, %v618_v0  ;;  %470 = vmatprep.subr.mxu1 %v618_v0  ;;  %v193_v18 = vld [vmem:[%s859_s5 + $0x28] sm:$0xff]  ;;  %v192_v19 = vld [vmem:[%s859_s5 + $0x20] sm:$0xff]  ;;  %v191_v20 = vld [vmem:[%s859_s5 + $0x18] sm:$0xff] }
  0x2b   :  { %471 = vmatpush3.msra.mxu1 %v202_v9  ;;  %v190_v21 = vld [vmem:[%s859_s5 + $0x10] sm:$0xff]  ;;  %v189_v22 = vld [vmem:[%s859_s5 + $0x8] sm:$0xff]  ;;  %v188_v23 = vld [vmem:[%s859_s5] sm:$0xff] }
  0x2c   :  { %472 = vmatprep.subr.mxu1 %v618_v0  ;;  %v421_v34 = vld [vmem:[%s857_s3] ss:$0 sm:$0xff]  ;;  %v422_v36 = vld [vmem:[#allocation4] ss:$0 sm:$0xff]  ;;  %v423_v40 = vld [vmem:[#allocation6] ss:$0 sm:$0xff] }
  0x2d   :  { %473 = vmatpush3.msra.mxu1 %v201_v10  ;;  %v327_v45 = vld [vmem:[%s863_s9 + $0x78] sm:$0xff]  ;;  %v326_v46 = vld [vmem:[%s863_s9 + $0x70] sm:$0xff]  ;;  %v325_v47 = vld [vmem:[%s863_s9 + $0x68] sm:$0xff] }
  0x2e   :  { %474 = vmatprep.subr.mxu1 %v618_v0  ;;  %504 = vmatpush3.msra.mxu0 %v327_v45  ;;  %v324_v48 = vld [vmem:[%s863_s9 + $0x60] sm:$0xff]  ;;  %v323_v49 = vld [vmem:[%s863_s9 + $0x58] sm:$0xff]  ;;  %v322_v50 = vld [vmem:[%s863_s9 + $0x50] sm:$0xff] }
  0x2f   :  { %475 = vmatpush3.msra.mxu1 %v200_v11  ;;  %505 = vmatprep.subr.mxu0 %v618_v0  ;;  %v321_v51 = vld [vmem:[%s863_s9 + $0x48] sm:$0xff]  ;;  %v320_v52 = vld [vmem:[%s863_s9 + $0x40] sm:$0xff]  ;;  %v319_v53 = vld [vmem:[%s863_s9 + $0x38] sm:$0xff] }
  0x30   :  { %476 = vmatprep.subr.mxu1 %v618_v0  ;;  %506 = vmatpush3.msra.mxu0 %v326_v46  ;;  %v318_v54 = vld [vmem:[%s863_s9 + $0x30] sm:$0xff]  ;;  %v317_v55 = vld [vmem:[%s863_s9 + $0x28] sm:$0xff]  ;;  %v316_v56 = vld [vmem:[%s863_s9 + $0x20] sm:$0xff] }
  0x31   :  { %477 = vmatpush3.msra.mxu1 %v199_v12  ;;  %507 = vmatprep.subr.mxu0 %v618_v0  ;;  %v315_v57 = vld [vmem:[%s863_s9 + $0x18] sm:$0xff]  ;;  %v314_v58 = vld [vmem:[%s863_s9 + $0x10] sm:$0xff]  ;;  %v313_v59 = vld [vmem:[%s863_s9 + $0x8] sm:$0xff] }
  0x32   :  { %478 = vmatprep.subr.mxu1 %v618_v0  ;;  %508 = vmatpush3.msra.mxu0 %v325_v47  ;;  %v312_v60 = vld [vmem:[%s863_s9] sm:$0xff] }
  0x33   :  { %479 = vmatpush3.msra.mxu1 %v198_v13  ;;  %509 = vmatprep.subr.mxu0 %v618_v0  ;;  %v424_v8 = vld [vmem:[%s861_s7] ss:$0 sm:$0xff] }
  0x34   :  { %480 = vmatprep.subr.mxu1 %v618_v0  ;;  %510 = vmatpush3.msra.mxu0 %v324_v48  ;;  %v426_v13 = vld [vmem:[%s864_s10] ss:$0 sm:$0xff] }
  0x35   :  { %481 = vmatpush3.msra.mxu1 %v197_v14  ;;  %511 = vmatprep.subr.mxu0 %v618_v0 }
  0x36   :  { %482 = vmatprep.subr.mxu1 %v618_v0  ;;  %512 = vmatpush3.msra.mxu0 %v323_v49 }
  0x37   :  { %483 = vmatpush3.msra.mxu1 %v196_v15  ;;  %513 = vmatprep.subr.mxu0 %v618_v0 }
  0x38   :  { %484 = vmatprep.subr.mxu1 %v618_v0  ;;  %514 = vmatpush3.msra.mxu0 %v322_v50 }
  0x39   :  { %485 = vmatpush3.msra.mxu1 %v195_v16  ;;  %515 = vmatprep.subr.mxu0 %v618_v0 }
  0x3a   :  { %486 = vmatprep.subr.mxu1 %v618_v0  ;;  %516 = vmatpush3.msra.mxu0 %v321_v51 }
  0x3b   :  { %487 = vmatpush3.msra.mxu1 %v194_v17  ;;  %517 = vmatprep.subr.mxu0 %v618_v0 }
  0x3c   :  { %488 = vmatprep.subr.mxu1 %v618_v0  ;;  %518 = vmatpush3.msra.mxu0 %v320_v52 }
  0x3d   :  { %489 = vmatpush3.msra.mxu1 %v193_v18  ;;  %519 = vmatprep.subr.mxu0 %v618_v0 }
  0x3e   :  { %490 = vmatprep.subr.mxu1 %v618_v0  ;;  %520 = vmatpush3.msra.mxu0 %v319_v53 }
  0x3f   :  { %491 = vmatpush3.msra.mxu1 %v192_v19  ;;  %521 = vmatprep.subr.mxu0 %v618_v0 }
  0x40   :  { %492 = vmatprep.subr.mxu1 %v618_v0  ;;  %522 = vmatpush3.msra.mxu0 %v318_v54 }
  0x41   :  { %493 = vmatpush3.msra.mxu1 %v191_v20  ;;  %523 = vmatprep.subr.mxu0 %v618_v0 }
  0x42   :  { %494 = vmatprep.subr.mxu1 %v618_v0  ;;  %524 = vmatpush3.msra.mxu0 %v317_v55 }
  0x43   :  { %495 = vmatpush3.msra.mxu1 %v190_v21  ;;  %525 = vmatprep.subr.mxu0 %v618_v0 }
  0x44   :  { %496 = vmatprep.subr.mxu1 %v618_v0  ;;  %526 = vmatpush3.msra.mxu0 %v316_v56 }
  0x45   :  { %497 = vmatpush3.msra.mxu1 %v189_v22  ;;  %527 = vmatprep.subr.mxu0 %v618_v0 }
  0x46   :  { %498 = vmatprep.subr.mxu1 %v618_v0  ;;  %528 = vmatpush3.msra.mxu0 %v315_v57 }
  0x47   :  { %499 = vmatpush3.msra.mxu1 %v188_v23  ;;  %529 = vmatprep.subr.mxu0 %v618_v0 }
  0x48   :  { %530 = vmatpush3.msra.mxu0 %v314_v58 }
  0x49   :  { %531 = vmatprep.subr.mxu0 %v618_v0 }
  0x4a   :  { %532 = vmatpush3.msra.mxu0 %v313_v59 }
  0x4b   :  { %533 = vmatprep.subr.mxu0 %v618_v0  ;;  %v425_v0 = vld [vmem:[%s862_s8] ss:$0 sm:$0xff] }
  0x4c   :  { %534 = vmatpush3.msra.mxu0 %v312_v60 }
  0xe9   :  { %v152_v4 = vpop.f32.mrf.mxu0 }
  0xea   :  { %v701_v5 = vadd.f32 %v419_v3, %v152_v4 }
  0xeb   :  { %v467_v6 = vpop.f32.mrf.mxu0 }
  0xec   :  { %158 = vadd.xlane.f32.xlu0 %v701_v5  ;;  %v162_v7 = vmul.f32 %v701_v5, %v701_v5 }
  0xf0   :  { %163 = vadd.xlane.f32.xlu0 %v162_v7 }
 0x175   :  { %v159_v24 = vpop.xlane.xlu0 %158 }
 0x176   :  { %v161_v25 = vmul.f32 0.0078125, %v159_v24 }
 0x178   :  { %v166_v27 = vmul.f32 %v161_v25, %v161_v25  ;;  %v171_v32 = vsub.f32 %v701_v5, %v161_v25 }
 0x179   :  { %v164_v26 = vpop.xlane.xlu0 %163 }
 0x17a   :  { %v165_v28 = vmul.f32 0.0078125, %v164_v26 }
 0x17c   :  { %v167_v29 = vsub.f32 %v165_v28, %v166_v27 }
 0x17e   :  { %v168_v30 = vmax.f32 %v167_v29, 0.0 }
 0x180   :  { %v169_v31 = vadd.f32 1e-05, %v168_v30 }
 0x182   :  { %543 = vrsqrt.f32 %v169_v31 }
 0x18f   :  { %v544_v33 = vpop.eup %543 }
 0x190   :  { %v172_v35 = vmul.f32 %v544_v33, %v171_v32 }
 0x192   :  { %v179_v37 = vmul.f32 %v421_v34, %v172_v35 }
 0x194   :  { %v186_v38 = vadd.f32 %v422_v36, %v179_v37 }
 0x196   :  { %v187_v39 = vmax.f32 %v186_v38, 0.0 }
 0x198   :  { %501 = vmatmul.mubr.f32.vlgmr.msra.gmra.mxu1 %v187_v39 }
 0x258   :  { %v277_v41 = vpop.f32.mrf.mxu1 }
 0x259   :  { %v773_v42 = vadd.f32 %v423_v40, %v277_v41 }
 0x25a   :  { %v502_v43 = vpop.f32.mrf.mxu1 }
 0x25b   :  { %283 = vadd.xlane.f32.xlu1 %v773_v42  ;;  %v286_v44 = vmul.f32 %v773_v42, %v773_v42 }
 0x25f   :  { %287 = vadd.xlane.f32.xlu1 %v286_v44 }
 0x2e4   :  { %v284_v61 = vpop.xlane.xlu1 %283 }
 0x2e5   :  { %v285_v62 = vmul.f32 0.0078125, %v284_v61 }
 0x2e7   :  { %v290_v1 = vmul.f32 %v285_v62, %v285_v62  ;;  %v295_v6 = vsub.f32 %v773_v42, %v285_v62 }
 0x2e8   :  { %v288_v63 = vpop.xlane.xlu1 %287 }
 0x2e9   :  { %v289_v2 = vmul.f32 0.0078125, %v288_v63 }
 0x2eb   :  { %v291_v3 = vsub.f32 %v289_v2, %v290_v1 }
 0x2ed   :  { %v292_v4 = vmax.f32 %v291_v3, 0.0 }
 0x2ef   :  { %v293_v5 = vadd.f32 1e-05, %v292_v4 }
 0x2f1   :  { %545 = vrsqrt.f32 %v293_v5 }
 0x2fe   :  { %v546_v7 = vpop.eup %545 }
 0x2ff   :  { %v296_v9 = vmul.f32 %v546_v7, %v295_v6 }
 0x301   :  { %v303_v10 = vmul.f32 %v424_v8, %v296_v9 }
 0x303   :  { %v310_v11 = vadd.f32 %v425_v0, %v303_v10 }
 0x305   :  { %v311_v12 = vmax.f32 %v310_v11, 0.0 }
 0x307   :  { %536 = vmatmul.mubr.f32.vlgmr.msra.gmra.mxu0 %v311_v12 }
 0x3c7   :  { %v401_v14 = vpop.f32.mrf.mxu0 }
 0x3c8   :  { %v402_v15 = vadd.f32 %v426_v13, %v401_v14 }
 0x3c9   :  { %v537_v16 = vpop.f32.mrf.mxu0 }
 0x3ca   :  { %v405_v17 = vsub.f32 0.0, %v402_v15 }
 0x3cc   :  { %v406_v18 = vmul.f32 1.442695, %v405_v17 }
 0x3ce   :  { %547 = vpow2.f32 %v406_v18 }
 0x3db   :  { %v548_v19 = vpop.eup %547 }
 0x3dc   :  { %v408_v20 = vadd.f32 1.0, %v548_v19 }
 0x3de   :  { %549 = vrcp.f32 %v408_v20 }
 0x3eb   :  { %v550_v21 = vpop.eup %549 }
 0x3ec   :  { %412 = vst.msk [vmem:[%s865_s11] sm:$0xff] %vm411_vm2, %v550_v21 }
 0x3ed   :  { %417 = vsyncpa [#allocation3], 1 }
 0x3ee   :  { %418 = vsyncpa [#allocation5], 1 }

</bundles_post_ra>
